<compile_context>
chip_gen: v5e
topology: v5e:2x2
jax: 0.10.0
libtpu: 0.0.40
codegen_flags: <defaults>
</compile_context>

<pallas_src>
import functools

import jax
import jax.numpy as jnp
from jax.experimental import pallas as pl
from jax.experimental.pallas import tpu as pltpu

_PAIRWISE_EPS = 1e-6   # matches torch.nn.functional.pairwise_distance default eps
_LANES = 128           # lane width of a vreg / lane-dense output block


def _device_kind():
    try:
        return jax.devices()[0].device_kind.lower()
    except Exception:
        return ""


def _num_partial_cores(kind):
    # Only v7x has 2 independent TensorCores per chip for a "parallel" grid axis
    # to shard across; forcing 2 partials on 1-TC chips just adds one wasted
    # clamped (re-DMA + fully-masked) step whenever n_blocks is odd.
    return 2 if "v7" in kind else 1


def _target_block_bytes(kind):
    # v7x: ~3.2 TB/s per TC makes each step's DMA ~2.3x shorter for the same
    # bytes, so the fixed per-step pipeline overhead needs bigger tiles to
    # amortize.  v5e/v6e: ~2 MiB tiles already sit near the HBM roofline.
    return (4 << 20) if "v7" in kind else (2 << 20)


def _sublane(dtype):
    # dtype-native sublane multiple: keeps loads unmasked / natively tiled.
    return 16 if dtype == jnp.bfloat16 else 8


def _lane_padded(dim):
    return max(_LANES, pl.cdiv(dim, _LANES) * _LANES)


def _pick_block_rows(batch, dim, itemsize, sublane, target_bytes, vmem_cap_bytes):
    """Rows per tile: size purely by bytes of the lane-padded embedding block,
    then bound the total VMEM footprint (2 inputs x 2 pipeline buffers +
    2 lane-padded label buffers + per-row accumulator) and round down to the
    dtype-native sublane multiple."""
    row_in_bytes = _lane_padded(dim) * itemsize
    rows = target_bytes // max(1, row_in_bytes)
    per_row_total = 4 * row_in_bytes + 2 * (_LANES * 4) + (_LANES * 4)
    rows = min(rows, (vmem_cap_bytes - (2 << 20)) // per_row_total)
    rows = max(sublane, (rows // sublane) * sublane)
    if rows >= batch:
        return batch  # single full-batch block (full-dim block shape is always legal)
    return int(rows)


def _vmem_limit_bytes(block_rows, dim, itemsize):
    in_blk = block_rows * _lane_padded(dim) * itemsize
    lbl_blk = block_rows * _LANES * 4          # (block_rows, 1) f32 tile, lane-padded
    acc = block_rows * _LANES * 4              # per-row accumulator, lane-padded
    budget = 4 * in_blk + 2 * lbl_blk + acc + (2 << 20)
    # Lower clamp = v5e scoped default; upper clamp stays well inside v7x's
    # 64 MiB physical VMEM (v5e/v6e have 128 MiB physical).
    return int(min(max(budget, 16 << 20), 48 << 20))


def _contrastive_loss_kernel(o1_ref, o2_ref, lbl_ref, out_ref, acc_ref, *,
                             margin, batch, block_rows):
    p = pl.program_id(0)           # partial-sum axis ("parallel", per TC on v7x)
    i = pl.program_id(1)           # batch-reduction axis ("arbitrary")
    n_inner = pl.num_programs(1)

    @pl.when(i == 0)
    def _init():
        acc_ref[...] = jnp.zeros_like(acc_ref)

    # Load (possibly bf16) tiles and upcast immediately; all math in f32.
    o1 = o1_ref[...].astype(jnp.float32)
    o2 = o2_ref[...].astype(jnp.float32)
    diff = o1 - o2 + _PAIRWISE_EPS                            # eps added to diff (torch legacy)
    sq_sum = jnp.sum(diff * diff, axis=-1, keepdims=True)     # (TB, 1) == d^2
    dist = jnp.sqrt(sq_sum)                                   # only needed for the hinge term
    lbl = lbl_ref[...].astype(jnp.float32)                    # (TB, 1)
    hinge = jnp.maximum(margin - dist, 0.0)
    per_row = (1.0 - lbl) * sq_sum + lbl * (hinge * hinge)    # (TB, 1)

    # Only the partial last tile / clamped out-of-range slots need row masking;
    # full interior tiles skip the iota/select entirely.
    blk = p * n_inner + i
    needs_mask = (blk + 1) * block_rows > batch

    @pl.when(needs_mask)
    def _accumulate_masked():
        row_ids = blk * block_rows + jax.lax.broadcasted_iota(
            jnp.int32, (block_rows, 1), 0)
        # Select (not multiply-by-mask) so garbage in Pallas-padded rows never propagates.
        acc_ref[...] += jnp.where(row_ids < batch, per_row, 0.0)

    @pl.when(jnp.logical_not(needs_mask))
    def _accumulate():
        acc_ref[...] += per_row

    @pl.when(i == n_inner - 1)
    def _finalize():
        # Single cross-sublane reduce of the per-row accumulator, then a
        # lane-dense write of this core's partial sum (broadcast across 128 lanes).
        total = jnp.sum(acc_ref[...])
        out_ref[...] = jnp.full(out_ref.shape, total, dtype=jnp.float32)


def contrastive_loss(output1, output2, label, margin=1.0, block_rows=None):
    """Pallas TPU implementation of ContrastiveLoss.forward.

    output1, output2: (B, D) float32 or bfloat16 embeddings
    label:            (B,) or (B, 1) (0 = similar pair, 1 = dissimilar)
    returns:          scalar float32 loss
    """
    output1 = jnp.asarray(output1)
    output2 = jnp.asarray(output2)
    if output1.dtype not in (jnp.bfloat16, jnp.float32):
        output1 = output1.astype(jnp.float32)
    if output2.dtype != output1.dtype:
        output2 = output2.astype(output1.dtype)
    label = jnp.asarray(label, jnp.float32).reshape(-1, 1)

    B, D = output1.shape
    assert output2.shape == (B, D)
    assert label.shape == (B, 1)

    kind = _device_kind()
    itemsize = output1.dtype.itemsize
    sublane = _sublane(output1.dtype)
    vmem_cap = 40 << 20   # footprint budget used only to bound the tile choice

    if block_rows is None:
        block_rows = _pick_block_rows(B, D, itemsize, sublane,
                                      _target_block_bytes(kind), vmem_cap)
    assert block_rows == B or block_rows % sublane == 0, block_rows

    n_blocks = pl.cdiv(B, block_rows)
    num_cores = _num_partial_cores(kind)
    if n_blocks < num_cores:
        num_cores = 1
    n_inner = pl.cdiv(n_blocks, num_cores)

    def block_map(p, i):
        # Clamp so block slots beyond n_blocks re-read the last block; the kernel's
        # row mask (based on the *unclamped* logical row index) zeroes them out.
        return (jnp.minimum(p * n_inner + i, n_blocks - 1), 0)

    kernel = functools.partial(
        _contrastive_loss_kernel,
        margin=float(margin),
        batch=B,
        block_rows=block_rows,
    )

    out = pl.pallas_call(
        kernel,
        out_shape=jax.ShapeDtypeStruct((1, num_cores * _LANES), jnp.float32),
        grid=(num_cores, n_inner),
        in_specs=[
            pl.BlockSpec((block_rows, D), block_map),
            pl.BlockSpec((block_rows, D), block_map),
            # Labels are <1% of traffic; left as (block_rows, 1) per review priority.
            pl.BlockSpec((block_rows, 1), block_map),
        ],
        out_specs=pl.BlockSpec((1, _LANES), lambda p, i: (0, p)),
        scratch_shapes=[pltpu.VMEM((block_rows, 1), jnp.float32)],
        compiler_params=pltpu.CompilerParams(
            dimension_semantics=("parallel", "arbitrary"),
            vmem_limit_bytes=_vmem_limit_bytes(block_rows, D, itemsize),
        ),
    )(output1, output2, label)

    partials = out.reshape(num_cores, _LANES)[:, 0]   # per-core partial sums
    return jnp.sum(partials) / B


def _reference_loss(o1, o2, label, margin=1.0):
    # Pure-JAX reference mirroring the PyTorch forward (also the recommended
    # path for tiny B*D where a kernel launch isn't worth it).
    o1 = jnp.asarray(o1).astype(jnp.float32)
    o2 = jnp.asarray(o2).astype(jnp.float32)
    d = jnp.sqrt(jnp.sum((o1 - o2 + _PAIRWISE_EPS) ** 2, axis=-1))
    label = jnp.asarray(label, jnp.float32).reshape(-1)
    return jnp.mean((1.0 - label) * d ** 2
                    + label * jnp.maximum(margin - d, 0.0) ** 2)


if __name__ == "__main__":
    key = jax.random.PRNGKey(0)
    k1, k2, k3, k4, k5, k6 = jax.random.split(key, 6)

    # Case 1: small shapes consistent with the module (batch=8, hidden=32), f32,
    # single full-batch block.
    B, D = 8, 32
    o1 = jax.random.normal(k1, (B, D), dtype=jnp.float32)
    o2 = jax.random.normal(k2, (B, D), dtype=jnp.float32)
    lbl = jax.random.bernoulli(k3, 0.5, (B,)).astype(jnp.float32)
    loss = contrastive_loss(o1, o2, lbl, margin=1.0)
    jax.block_until_ready(loss)
    ref = _reference_loss(o1, o2, lbl, margin=1.0)
    assert jnp.allclose(loss, ref, rtol=1e-4, atol=1e-5), (loss, ref)

    # Case 2: tiled path with a partial last tile and an odd block count
    # (exercises masking, block-index clamping, and — on v7x — the 2-partial
    # "parallel" axis) using bf16 inputs with f32 accumulation.
    B2, D2 = 72, 256
    p1 = jax.random.normal(k4, (B2, D2), dtype=jnp.bfloat16)
    p2 = jax.random.normal(k5, (B2, D2), dtype=jnp.bfloat16)
    l2 = jax.random.bernoulli(k6, 0.5, (B2,)).astype(jnp.float32)
    loss2 = contrastive_loss(p1, p2, l2, margin=1.0, block_rows=16)
    jax.block_until_ready(loss2)
    ref2 = _reference_loss(p1, p2, l2, margin=1.0)
    assert jnp.allclose(loss2, ref2, rtol=1e-4, atol=1e-4), (loss2, ref2)

    # Case 3: auto tile sizing on a larger batch (exercises the byte-based,
    # sublane-rounded block_rows heuristic with a partial last tile).
    B3, D3 = 300, 128
    q1 = jax.random.normal(k1, (B3, D3), dtype=jnp.float32)
    q2 = jax.random.normal(k2, (B3, D3), dtype=jnp.float32)
    l3 = jax.random.bernoulli(k3, 0.5, (B3,)).astype(jnp.float32)
    loss3 = contrastive_loss(q1, q2, l3, margin=1.0)
    jax.block_until_ready(loss3)
    ref3 = _reference_loss(q1, q2, l3, margin=1.0)
    assert jnp.allclose(loss3, ref3, rtol=1e-4, atol=1e-4), (loss3, ref3)

    print("KERNEL_OK")
</pallas_src>

<mosaic_0001>
module attributes {stable_mosaic.version = 11 : i64} {
  func.func @_contrastive_loss_kernel(%arg0: i32, %arg1: i32, %arg2: memref<8x32xf32, #tpu.memory_space<vmem>>, %arg3: memref<8x32xf32, #tpu.memory_space<vmem>>, %arg4: memref<8x1xf32, #tpu.memory_space<vmem>>, %arg5: memref<1x128xf32, #tpu.memory_space<vmem>>, %arg6: memref<8x1xf32, #tpu.memory_space<vmem>>) attributes {dimension_semantics = [#tpu.dimension_semantics<parallel>, #tpu.dimension_semantics<arbitrary>], iteration_bounds = array<i64: 1, 1>, scalar_prefetch = 0 : i64, scratch_operands = 1 : i64, tpu.core_type = #tpu.core_type<tc>, window_params = [{transform_indices = @transform_0, window_bounds = array<i64: 8, 32>}, {transform_indices = @transform_1, window_bounds = array<i64: 8, 32>}, {transform_indices = @transform_2, window_bounds = array<i64: 8, 1>}, {transform_indices = @transform_3, window_bounds = array<i64: 1, 128>}]} {
    %c0_i32 = arith.constant 0 : i32
    %0 = arith.cmpi eq, %arg1, %c0_i32 : i32
    %1 = arith.extui %0 : i1 to i32
    %c0_i32_0 = arith.constant 0 : i32
    %2 = arith.cmpi ne, %1, %c0_i32_0 : i32
    scf.if %2 {
      %cst_16 = arith.constant 0.000000e+00 : f32
      %36 = vector.broadcast %cst_16 : f32 to vector<8x1xf32>
      %c0_17 = arith.constant 0 : index
      %c0_18 = arith.constant 0 : index
      %37 = vector.load %arg6[%c0_17, %c0_18] : memref<8x1xf32, #tpu.memory_space<vmem>>, vector<8x1xf32>
      tpu.vector_store %arg6[%c0_17, %c0_18], %36 {strides = array<i32>} : memref<8x1xf32, #tpu.memory_space<vmem>>, vector<8x1xf32>,
    } else {
    }
    %c0 = arith.constant 0 : index
    %c0_1 = arith.constant 0 : index
    %3 = vector.load %arg2[%c0, %c0_1] : memref<8x32xf32, #tpu.memory_space<vmem>>, vector<8x32xf32>
    %c0_2 = arith.constant 0 : index
    %c0_3 = arith.constant 0 : index
    %4 = vector.load %arg3[%c0_2, %c0_3] : memref<8x32xf32, #tpu.memory_space<vmem>>, vector<8x32xf32>
    %5 = arith.subf %3, %4 : vector<8x32xf32>
    %cst = arith.constant 9.99999997E-7 : f32
    %6 = vector.broadcast %cst : f32 to vector<8x32xf32>
    %7 = arith.addf %5, %6 : vector<8x32xf32>
    %8 = arith.mulf %7, %7 : vector<8x32xf32>
    %cst_4 = arith.constant dense<0.000000e+00> : vector<8xf32>
    %9 = vector.multi_reduction <add>, %8, %cst_4 [1] : vector<8x32xf32> to vector<8xf32>
    %10 = vector.shape_cast %9 : vector<8xf32> to vector<8x1xf32>
    %11 = math.sqrt %10 : vector<8x1xf32>
    %c0_5 = arith.constant 0 : index
    %c0_6 = arith.constant 0 : index
    %12 = vector.load %arg4[%c0_5, %c0_6] : memref<8x1xf32, #tpu.memory_space<vmem>>, vector<8x1xf32>
    %cst_7 = arith.constant 1.000000e+00 : f32
    %13 = vector.broadcast %cst_7 : f32 to vector<8x1xf32>
    %14 = arith.subf %13, %11 : vector<8x1xf32>
    %cst_8 = arith.constant 0.000000e+00 : f32
    %15 = vector.broadcast %cst_8 : f32 to vector<8x1xf32>
    %16 = arith.maximumf %14, %15 : vector<8x1xf32>
    %cst_9 = arith.constant 1.000000e+00 : f32
    %17 = vector.broadcast %cst_9 : f32 to vector<8x1xf32>
    %18 = arith.subf %17, %12 : vector<8x1xf32>
    %19 = arith.mulf %18, %10 : vector<8x1xf32>
    %20 = arith.mulf %16, %16 : vector<8x1xf32>
    %21 = arith.mulf %12, %20 : vector<8x1xf32>
    %22 = arith.addf %19, %21 : vector<8x1xf32>
    %c1_i32 = arith.constant 1 : i32
    %23 = arith.muli %arg0, %c1_i32 : i32
    %24 = arith.addi %23, %arg1 : i32
    %c1_i32_10 = arith.constant 1 : i32
    %25 = arith.addi %24, %c1_i32_10 : i32
    %c8_i32 = arith.constant 8 : i32
    %26 = arith.muli %25, %c8_i32 : i32
    %c8_i32_11 = arith.constant 8 : i32
    %27 = arith.cmpi sgt, %26, %c8_i32_11 : i32
    %28 = arith.extui %27 : i1 to i32
    %c0_i32_12 = arith.constant 0 : i32
    %29 = arith.cmpi ne, %28, %c0_i32_12 : i32
    scf.if %29 {
      %c8_i32_16 = arith.constant 8 : i32
      %36 = arith.muli %24, %c8_i32_16 : i32
      %37 = tpu.iota {dimensions = array<i32: 0>} : vector<8x1xi32>
      %38 = vector.broadcast %36 : i32 to vector<8x1xi32>
      %39 = arith.addi %38, %37 : vector<8x1xi32>
      %c0_17 = arith.constant 0 : index
      %c0_18 = arith.constant 0 : index
      %40 = vector.load %arg6[%c0_17, %c0_18] : memref<8x1xf32, #tpu.memory_space<vmem>>, vector<8x1xf32>
      %c8_i32_19 = arith.constant 8 : i32
      %41 = vector.broadcast %c8_i32_19 : i32 to vector<8x1xi32>
      %42 = arith.cmpi slt, %39, %41 : vector<8x1xi32>
      %cst_20 = arith.constant 0.000000e+00 : f32
      %43 = vector.broadcast %cst_20 : f32 to vector<8x1xf32>
      %44 = arith.select %42, %22, %43 : vector<8x1xi1>, vector<8x1xf32>
      %45 = arith.addf %40, %44 : vector<8x1xf32>
      %c0_21 = arith.constant 0 : index
      %c0_22 = arith.constant 0 : index
      %46 = vector.load %arg6[%c0_21, %c0_22] : memref<8x1xf32, #tpu.memory_space<vmem>>, vector<8x1xf32>
      tpu.vector_store %arg6[%c0_21, %c0_22], %45 {strides = array<i32>} : memref<8x1xf32, #tpu.memory_space<vmem>>, vector<8x1xf32>,
    } else {
    }
    %true = arith.constant true
    %30 = arith.xori %27, %true : i1
    %31 = arith.extui %30 : i1 to i32
    %c0_i32_13 = arith.constant 0 : i32
    %32 = arith.cmpi ne, %31, %c0_i32_13 : i32
    scf.if %32 {
      %c0_16 = arith.constant 0 : index
      %c0_17 = arith.constant 0 : index
      %36 = vector.load %arg6[%c0_16, %c0_17] : memref<8x1xf32, #tpu.memory_space<vmem>>, vector<8x1xf32>
      %37 = arith.addf %36, %22 : vector<8x1xf32>
      %c0_18 = arith.constant 0 : index
      %c0_19 = arith.constant 0 : index
      %38 = vector.load %arg6[%c0_18, %c0_19] : memref<8x1xf32, #tpu.memory_space<vmem>>, vector<8x1xf32>
      tpu.vector_store %arg6[%c0_18, %c0_19], %37 {strides = array<i32>} : memref<8x1xf32, #tpu.memory_space<vmem>>, vector<8x1xf32>,
    } else {
    }
    %c0_i32_14 = arith.constant 0 : i32
    %33 = arith.cmpi eq, %arg1, %c0_i32_14 : i32
    %34 = arith.extui %33 : i1 to i32
    %c0_i32_15 = arith.constant 0 : i32
    %35 = arith.cmpi ne, %34, %c0_i32_15 : i32
    scf.if %35 {
      %c0_16 = arith.constant 0 : index
      %c0_17 = arith.constant 0 : index
      %36 = vector.load %arg6[%c0_16, %c0_17] : memref<8x1xf32, #tpu.memory_space<vmem>>, vector<8x1xf32>
      %37 = vector.shape_cast %36 : vector<8x1xf32> to vector<1x8x1xf32>
      %cst_18 = arith.constant dense<0.000000e+00> : vector<1xf32>
      %38 = vector.multi_reduction <add>, %37, %cst_18 [1, 2] : vector<1x8x1xf32> to vector<1xf32>
      %39 = vector.shape_cast %38 : vector<1xf32> to vector<1x1x1xf32>
      %40 = vector.extract %39[0, 0, 0] : f32 from vector<1x1x1xf32>
      %41 = vector.broadcast %40 : f32 to vector<1x128xf32>
      %c0_19 = arith.constant 0 : index
      %c0_20 = arith.constant 0 : index
      %42 = vector.load %arg5[%c0_19, %c0_20] : memref<1x128xf32, #tpu.memory_space<vmem>>, vector<1x128xf32>
      tpu.vector_store %arg5[%c0_19, %c0_20], %41 {strides = array<i32>} : memref<1x128xf32, #tpu.memory_space<vmem>>, vector<1x128xf32>,
    } else {
    }
    return
  }
  func.func @transform_0(%arg0: i32, %arg1: i32) -> (i32, i32) {
    %c1_i32 = arith.constant 1 : i32
    %0 = arith.muli %arg0, %c1_i32 : i32
    %1 = arith.addi %0, %arg1 : i32
    %c0_i32 = arith.constant 0 : i32
    %2 = arith.minsi %1, %c0_i32 : i32
    %c0_i32_0 = arith.constant 0 : i32
    %c0_i32_1 = arith.constant 0 : i32
    return %2, %c0_i32_0 : i32, i32
  }
  func.func @transform_1(%arg0: i32, %arg1: i32) -> (i32, i32) {
    %c1_i32 = arith.constant 1 : i32
    %0 = arith.muli %arg0, %c1_i32 : i32
    %1 = arith.addi %0, %arg1 : i32
    %c0_i32 = arith.constant 0 : i32
    %2 = arith.minsi %1, %c0_i32 : i32
    %c0_i32_0 = arith.constant 0 : i32
    %c0_i32_1 = arith.constant 0 : i32
    return %2, %c0_i32_0 : i32, i32
  }
  func.func @transform_2(%arg0: i32, %arg1: i32) -> (i32, i32) {
    %c1_i32 = arith.constant 1 : i32
    %0 = arith.muli %arg0, %c1_i32 : i32
    %1 = arith.addi %0, %arg1 : i32
    %c0_i32 = arith.constant 0 : i32
    %2 = arith.minsi %1, %c0_i32 : i32
    %c0_i32_0 = arith.constant 0 : i32
    %c0_i32_1 = arith.constant 0 : i32
    return %2, %c0_i32_0 : i32, i32
  }
  func.func @transform_3(%arg0: i32, %arg1: i32) -> (i32, i32) {
    %c0_i32 = arith.constant 0 : i32
    %c0_i32_0 = arith.constant 0 : i32
    return %c0_i32, %arg0 : i32, i32
  }
}

</mosaic_0001>

<bundles_post_ra>
// kernel: tpu_custom_call.1
= control target key start
LH: loop header
LB: loop body
LE: loop exit
PB: predicated region body
PF: predicated region fallthrough
CT: control target
= control target key end

     0   :  { %8 = vsyncpa [#allocation4], 0  ;;  %s297_s0 = inlined_call_operand.vmem [shape: f32[8,32], index: 0, kind: input, shape index: {}]   ;;  %s298_s1 = inlined_call_operand.hbm [shape: f32[8,32], index: 1, kind: input, shape index: {}]   ;;  %s299_s2 = inlined_call_operand.vmem [shape: f32[8,1], index: 2, kind: input, shape index: {}]   ;;  %s300_s3 = inlined_call_operand.hbm [shape: f32[1,128], index: 3, kind: output, shape index: {}]  }
   0x1   :  { %9 = vsyncpa [#allocation5], 0  ;;  %s32_s14 = sshll.u32 %s298_s1, 4  ;;  %s259_s15 = smov [#allocation3]   ;;  %s33_s14 = int_to_ptr.hbm [resolvable:$true] %s32_s14 }
   0x2   :  { %s34_s16 = sshll.u32 %s259_s15, 4  ;;  %s35_s16 = int_to_ptr.vmem [resolvable:$true] %s34_s16 }
   0x3   :  { %37 = dma.hbm_to_vmem [thread:$0]  %s33_s14, 128, %s35_s16, [#allocation4]  }
   0x4   :  { %255 = dma.done.wait [#allocation4], 128  }
   0x5   :  { %256 = vsyncadd [#allocation4], 4294967168  ;;  %v97_v0 = vld [vmem:[%s297_s0] sm:$0xff]  ;;  %v98_v1 = vld [vmem:[#allocation3] sm:$0xff]  ;;  %vm102_vm0 = vcmask 261120   ;;  %vm95_vm1 = vcmask 7168  }
   0x6   :  { %v99_v2 = vsub.f32 %v97_v0, %v98_v1  ;;  %v260_v6 = vmov 0.0   ;;  %v118_v17 = vld [vmem:[%s299_s2] sm:$0xff]  ;;  %s261_s2 = smov [#allocation6]   ;;  %s176_s22 = sshll.u32 %s300_s3, 4  ;;  %s177_s22 = int_to_ptr.hbm [resolvable:$true] %s176_s22 }
   0x7   :  { %96 = vst.msk [vmem:[#allocation2] sm:$0xff] %vm95_vm1, %v260_v6  ;;  %v121_v20 = vsub.f32 1.0, %v118_v17  ;;  %s174_s19 = sshll.u32 %s261_s2, 4  ;;  %s175_s19 = int_to_ptr.vmem [resolvable:$true] %s174_s19 }
   0x8   :  { %v100_v3 = vadd.f32 1e-06, %v99_v2 }
   0xa   :  { %v101_v4 = vmul.f32 %v100_v3, %v100_v3 }
   0xc   :  { %v103_v5 = vsel %vm102_vm0, %v101_v4, 0.0 }
   0xd   :  { %104 = vadd.xlane.f32.xlu0 %v103_v5 }
   0xe   :  { %v148_v25 = vld [vmem:[#allocation2] sm:$0xff] }
  0x80   :  { %v105_v7 = vpop.xlane.xlu0 %104 }
  0x81   :  { %205 = vrsqrt.f32 %v105_v7  ;;  %vm113_vm2 = vcmp.eq.f32.partialorder %v105_v7, inf  ;;  %v116_v15 = vand.u32 2147483648, %v105_v7  ;;  %vm115_vm3 = vcmp.eq.f32.partialorder %v105_v7, 0.0 }
  0x82   :  { %v122_v23 = vmul.f32 %v121_v20, %v105_v7 }
  0x87   :  { %v206_v8 = vpop.eup %205 }
  0x88   :  { %v107_v9 = vmul.f32 %v206_v8, %v105_v7 }
  0x8a   :  { %v108_v10 = vmul.f32 %v206_v8, %v107_v9 }
  0x8c   :  { %v109_v11 = vmul.f32 0.5, %v108_v10 }
  0x8e   :  { %v110_v12 = vsub.f32 1.5, %v109_v11 }
  0x90   :  { %v111_v13 = vmul.f32 %v206_v8, %v110_v12 }
  0x92   :  { %v112_v14 = vmul.f32 %v111_v13, %v105_v7 }
  0x94   :  { %v114_v16 = vsel %vm113_vm2, %v105_v7, %v112_v14 }
  0x95   :  { %v117_v18 = vsel %vm115_vm3, %v116_v15, %v114_v16 }
  0x96   :  { %v119_v19 = vsub.f32 1.0, %v117_v18 }
  0x98   :  { %v120_v21 = vmax.f32 %v119_v19, 0.0 }
  0x9a   :  { %v123_v22 = vmul.f32 %v120_v21, %v120_v21 }
  0x9c   :  { %v124_v24 = vmul.f32 %v123_v22, %v118_v17 }
  0x9e   :  { %v125_v26 = vadd.f32 %v124_v24, %v122_v23 }
  0xa0   :  { %v149_v27 = vadd.f32 %v148_v25, %v125_v26 }
  0xa2   :  { %151 = vst.msk [vmem:[#allocation2] sm:$0xff] %vm95_vm1, %v149_v27 }
  0xa9   :  { %v155_v28 = vld [vmem:[#allocation2] sm:$0xff] }
  0xaa   :  { %v157_v29 = vsel %vm95_vm1, %v155_v28, 0.0 }
  0xab   :  { %158 = vadd.xlane.f32.xlu0 %v157_v29 }
 0x11e   :  { %v159_v30 = vpop.xlane.xlu0 %158 }
 0x11f   :  { %v160_v31 = vrot.slane %v159_v30, 4 }
 0x121   :  { %v161_v32 = vadd.f32 %v160_v31, %v159_v30 }
 0x123   :  { %v162_v33 = vrot.slane %v161_v32, 2 }
 0x125   :  { %v163_v34 = vadd.f32 %v162_v33, %v161_v32 }
 0x127   :  { %v164_v35 = vrot.slane %v163_v34, 1 }
 0x129   :  { %v165_v36 = vadd.f32 %v164_v35, %v163_v34 }
 0x12b   :  { %200 = vpush %v165_v36 }
 0x15c   :  { %s201_s23 = spop %200 }
 0x15d   :  { %v167_v37 = vstv %s201_s23 }
 0x15e   :  { %168 = vst [vmem:[#allocation6] sm:$0x1] %v167_v37 }
 0x15f   :  { %179 = dma.vmem_to_hbm [thread:$0]  %s175_s19, 16, %s177_s22, [#allocation5]  }
 0x160   :  { %257 = dma.done.wait [#allocation5], 16  }
 0x161   :  { %258 = vsyncadd [#allocation5], 4294967280 }
 0x162   :  { %184 = vsyncpa [#allocation4], 1 }
 0x163   :  { %185 = vsyncpa [#allocation5], 1 }

</bundles_post_ra>
